<compile_context>
chip_gen: v7x
topology: tpu7x:2x2x1
jax: 0.10.0
libtpu: 0.0.40
codegen_flags: <defaults>
</compile_context>

<pallas_src>
import functools
import math

import jax
import jax.numpy as jnp
from jax.experimental import pallas as pl
from jax.experimental.pallas import tpu as pltpu


def _round_up(x, m):
    return (x + m - 1) // m * m


def _pad_to(x, shape):
    pads = tuple((0, t - s) for s, t in zip(x.shape, shape))
    if any(p[1] for p in pads):
        return jnp.pad(x, pads)
    return x


def _vmem_capacity_bytes():
    try:
        cap = getattr(pltpu.get_tpu_info(), "vmem_capacity_bytes", None)
        if cap:
            return int(cap)
    except Exception:
        pass
    return 64 * 1024 * 1024  # conservative default (v7x per-TC VMEM)


def _vmem_step_bytes(bb, s_pad, k_pad, k_lane, d, hs_bytes):
    """Rough per-grid-step VMEM footprint used to size the batch block."""
    bf, f32 = 2, 4
    io = 2 * (2 * bb * s_pad * d * bf)                         # tgt, pos (x2 buf)
    io += 2 * (bb * k_lane * f32 + bb * k_pad * d * hs_bytes)  # logits, hs (x2 buf)
    w = (d * k_pad + 3 * d * d + k_pad * d) * bf + k_pad * f32 # single-buffered weights
    inter = 2 * bb * s_pad * d * (f32 + bf)                    # k/v f32 + bf16 copies
    inter += bb * s_pad * k_pad * (2 * f32 + bf)               # scores, p, p^T
    inter += bb * k_pad * d * (2 * f32)                        # ctx, hs f32
    return io + w + inter


def _choose_block_batch(batch, s_pad, k_pad, k_lane, d, hs_bytes, budget):
    # Keep >= 2 grid steps whenever B > 1 so both v7x TensorCores get work.
    bb_cap = max(1, -(-batch // 2)) if batch > 1 else 1
    for cand in (32, 16, 8, 4, 2, 1):
        if cand > bb_cap:
            continue
        if _vmem_step_bytes(cand, s_pad, k_pad, k_lane, d, hs_bytes) <= budget:
            return cand
    return 1


def q2l_kernel(tgt_ref, pos_ref, qT_ref, wkv_ref, wo_ref, gw_w_ref, gw_b_ref,
               out_ref, hs_ref, *, s_actual):
    """One batch block.  tgt/pos: (BB, S_pad, D) bf16; params full-size."""
    BB, S_pad, D = tgt_ref.shape
    K_pad = qT_ref.shape[1]
    K_lane = out_ref.shape[2]
    bf16 = jnp.bfloat16
    f32 = jnp.float32

    tgt = tgt_ref[...]            # (BB, S_pad, D) bf16
    pos = pos_ref[...]

    # --- fused K/V projections: one (BB*S_pad, D) x (D, D) matmul each; the
    #     two weights arrive co-located in a single (2, D, D) block ----------
    rows_k = (tgt + pos).reshape(BB * S_pad, D)
    rows_v = tgt.reshape(BB * S_pad, D)
    k2d = jnp.dot(rows_k, wkv_ref[0], preferred_element_type=f32).astype(bf16)
    v2d = jnp.dot(rows_v, wkv_ref[1], preferred_element_type=f32).astype(bf16)

    # --- scores as ONE 2D MXU matmul with M = BB*S_pad; q arrives already
    #     projected, 1/sqrt(d)-scaled and transposed to (D, K_pad) -----------
    scores = jnp.dot(k2d, qT_ref[...], preferred_element_type=f32)
    scores = scores.reshape(BB, S_pad, K_pad)

    if s_actual != S_pad:  # static branch: mask padded key positions
        sidx = jax.lax.broadcasted_iota(jnp.int32, (1, S_pad, 1), 1)
        scores = jnp.where(sidx < s_actual, scores, jnp.float32(-1e30))

    # --- softmax over the key axis (axis=1), math in f32 --------------------
    m = jnp.max(scores, axis=1, keepdims=True)               # (BB, 1, K_pad)
    p = jnp.exp(scores - m)                                   # (BB, S_pad, K_pad)
    inv = pl.reciprocal(jnp.sum(p, axis=1, keepdims=True), approx=True)
    p_t = jnp.swapaxes(p * inv, 1, 2).astype(bf16)            # (BB, K_pad, S_pad)

    ctx = jnp.einsum("bks,bsd->bkd", p_t, v2d.reshape(BB, S_pad, D),
                     preferred_element_type=f32)              # (BB, K_pad, D)

    # --- output projection over all BB*K rows at once -----------------------
    hs = jnp.dot(ctx.reshape(BB * K_pad, D).astype(bf16), wo_ref[...],
                 preferred_element_type=f32).reshape(BB, K_pad, D)

    # --- GroupWiseLinear head: (W * hs).sum(-1) + b --------------------------
    logits = jnp.sum(gw_w_ref[...].astype(f32)[None] * hs, axis=-1)
    logits = logits + gw_b_ref[...]                           # (BB, K_pad)

    pad_lanes = K_lane - K_pad
    if pad_lanes:  # static: emit a lane-dense (BB, 1, K_lane) block
        logits = jnp.concatenate(
            [logits, jnp.zeros((BB, pad_lanes), f32)], axis=-1)

    out_ref[...] = logits.reshape(BB, 1, K_lane)
    hs_ref[...] = hs.astype(hs_ref.dtype)


def q2l_forward(tgt, pos, params, *, hs_dtype=jnp.bfloat16):
    """Returns (out: (B, K), hs: (B, K, D)) matching the PyTorch module."""
    B, S, D = tgt.shape
    K = params["query_embed"].shape[0]
    cdt = jnp.bfloat16
    hs_bytes = jnp.dtype(hs_dtype).itemsize

    # --- padding / batch blocking -------------------------------------------
    K_pad = _round_up(K, 16)      # bf16 sublane multiple (q, hs, gw_w rows)
    S_pad = _round_up(S, 16)      # bf16 sublane multiple (tgt/pos rows)
    K_lane = _round_up(K, 128)    # lane-dense logits output

    budget = int(_vmem_capacity_bytes()) * 3 // 4     # ~48 MiB v7x, ~96 MiB v5e/v6e
    BB = _choose_block_batch(B, S_pad, K_pad, K_lane, D, hs_bytes, budget)
    B_pad = _round_up(B, BB)
    n_b = B_pad // BB

    # --- hoisted, batch-invariant query projection (1/sqrt(d) folded in),
    #     padded and pre-transposed to (D, K_pad) ----------------------------
    scale = 1.0 / math.sqrt(D)
    q = jnp.dot(params["query_embed"].astype(cdt), params["wq"].astype(cdt),
                preferred_element_type=jnp.float32) * scale
    qT = _pad_to(q.astype(cdt), (K_pad, D)).T                 # (D, K_pad) bf16

    # K/V weights co-located in one tensor -> one DMA per grid residency.
    wkv = jnp.stack([params["wk"], params["wv"]], axis=0).astype(cdt)  # (2, D, D)
    wo = params["wo"].astype(cdt)

    gw_w = _pad_to(params["gw_w"].reshape(K, D), (K_pad, D)).astype(cdt)  # bf16
    gw_b = _pad_to(params["gw_b"].reshape(1, K), (1, K_pad))              # f32

    def pad_act(x):
        return jnp.pad(x, ((0, B_pad - B), (0, S_pad - S), (0, 0))).astype(cdt)

    tgt_p = pad_act(tgt)
    pos_p = pad_act(pos)

    kernel = functools.partial(q2l_kernel, s_actual=S)

    def wspec(shape):
        # Constant-index weights: single-buffer to cut VMEM residency.
        return pl.BlockSpec(shape, lambda b: (0,) * len(shape),
                            pipeline_mode=pl.Buffered(1))

    flops = (4 * B_pad * S_pad * D * D            # K/V projections
             + 2 * B_pad * S_pad * D * K_pad      # scores
             + 2 * B_pad * K_pad * S_pad * D      # attn @ V
             + 2 * B_pad * K_pad * D * D          # output projection
             + 2 * B_pad * K_pad * D)             # GroupWiseLinear head
    transcendentals = B_pad * S_pad * K_pad + B_pad * K_pad
    bytes_accessed = (2 * B_pad * S_pad * D * 2          # tgt + pos (bf16)
                      + B_pad * K_pad * D * hs_bytes     # hs out
                      + B_pad * K_lane * 4               # logits out
                      + (D * K_pad + 3 * D * D + K_pad * D) * 2 + K_pad * 4)
    cost = pl.CostEstimate(flops=int(flops),
                           transcendentals=int(transcendentals),
                           bytes_accessed=int(bytes_accessed))

    out_p, hs_p = pl.pallas_call(
        kernel,
        grid=(n_b,),
        in_specs=[
            pl.BlockSpec((BB, S_pad, D), lambda b: (b, 0, 0)),   # tgt
            pl.BlockSpec((BB, S_pad, D), lambda b: (b, 0, 0)),   # pos
            wspec((D, K_pad)),                                   # q^T (pre-projected)
            wspec((2, D, D)),                                    # wk | wv
            wspec((D, D)),                                       # wo
            wspec((K_pad, D)),                                   # GroupWiseLinear W
            wspec((1, K_pad)),                                   # GroupWiseLinear b
        ],
        out_specs=(
            pl.BlockSpec((BB, 1, K_lane), lambda b: (b, 0, 0)),  # logits (lane-dense)
            pl.BlockSpec((BB, K_pad, D), lambda b: (b, 0, 0)),   # hs
        ),
        out_shape=(
            jax.ShapeDtypeStruct((B_pad, 1, K_lane), jnp.float32),
            jax.ShapeDtypeStruct((B_pad, K_pad, D), hs_dtype),
        ),
        compiler_params=pltpu.CompilerParams(
            dimension_semantics=("parallel",),   # shards batch across TCs (v7x)
            vmem_limit_bytes=int(budget),
        ),
        cost_estimate=cost,
    )(tgt_p, pos_p, qT, wkv, wo, gw_w, gw_b)

    return out_p[:B, 0, :K], hs_p[:B, :K, :]


def q2l_reference(tgt, pos, params):
    """Pure-JAX reference with matching numerics (bf16 matmul inputs, f32 accum)."""
    bf = jnp.bfloat16
    d = params["query_embed"].shape[-1]
    wq = params["wq"].astype(bf)
    wk = params["wk"].astype(bf)
    wv = params["wv"].astype(bf)
    wo = params["wo"].astype(bf)
    q = jnp.dot(params["query_embed"].astype(bf), wq,
                preferred_element_type=jnp.float32) / math.sqrt(d)
    k = jnp.einsum("bsd,de->bse", (tgt + pos).astype(bf), wk,
                   preferred_element_type=jnp.float32)
    v = jnp.einsum("bsd,de->bse", tgt.astype(bf), wv,
                   preferred_element_type=jnp.float32)
    scores = jnp.einsum("kd,bsd->bks", q.astype(bf), k.astype(bf),
                        preferred_element_type=jnp.float32)
    attn = jax.nn.softmax(scores, axis=-1)
    ctx = jnp.einsum("bks,bsd->bkd", attn.astype(bf), v.astype(bf),
                     preferred_element_type=jnp.float32)
    hs = jnp.einsum("bkd,de->bke", ctx.astype(bf), wo,
                    preferred_element_type=jnp.float32)
    out = jnp.sum(params["gw_w"] * hs, axis=-1) + params["gw_b"]
    return out, hs


def init_params(key, num_class, hidden_dim):
    ks = jax.random.split(key, 7)
    stdv = 1.0 / math.sqrt(hidden_dim)
    return {
        # nn.Embedding default init: N(0, 1)
        "query_embed": jax.random.normal(ks[0], (num_class, hidden_dim), jnp.float32),
        # stand-in transformer projection weights
        "wq": jax.random.normal(ks[1], (hidden_dim, hidden_dim), jnp.float32) * stdv,
        "wk": jax.random.normal(ks[2], (hidden_dim, hidden_dim), jnp.float32) * stdv,
        "wv": jax.random.normal(ks[3], (hidden_dim, hidden_dim), jnp.float32) * stdv,
        "wo": jax.random.normal(ks[4], (hidden_dim, hidden_dim), jnp.float32) * stdv,
        # GroupWiseLinear: uniform(-stdv, stdv), shapes (1, K, D) / (1, K)
        "gw_w": jax.random.uniform(ks[5], (1, num_class, hidden_dim),
                                   jnp.float32, -stdv, stdv),
        "gw_b": jax.random.uniform(ks[6], (1, num_class),
                                   jnp.float32, -stdv, stdv),
    }


if __name__ == "__main__":
    # batch, flattened-spatial, num_class, hidden_dim
    # (S=12 exercises the key-padding mask; B=3 exercises batch padding;
    #  K=8 exercises query-row padding and the 128-lane logits pad.)
    B, S, K, D = 3, 12, 8, 32

    root = jax.random.PRNGKey(0)
    k_params, k_tgt, k_pos = jax.random.split(root, 3)
    params = init_params(k_params, K, D)
    tgt = jax.random.normal(k_tgt, (B, S, D), jnp.float32)
    pos = jax.random.normal(k_pos, (B, S, D), jnp.float32)

    out, hs = jax.jit(q2l_forward)(tgt, pos, params)
    out = jax.block_until_ready(out)
    hs = jax.block_until_ready(hs)

    ref_out, ref_hs = q2l_reference(tgt, pos, params)
    assert out.shape == (B, K) and hs.shape == (B, K, D)
    assert jnp.allclose(out, ref_out, rtol=3e-2, atol=3e-2)
    assert jnp.allclose(hs.astype(jnp.float32), ref_hs, rtol=3e-2, atol=3e-2)

    print("KERNEL_OK")
</pallas_src>

<mosaic_0001>
module attributes {stable_mosaic.version = 11 : i64} {
  func.func @q2l_kernel(%arg0: i32, %arg1: memref<2x16x32xbf16, #tpu.memory_space<vmem>>, %arg2: memref<2x16x32xbf16, #tpu.memory_space<vmem>>, %arg3: memref<32x16xbf16, #tpu.memory_space<vmem>>, %arg4: memref<2x32x32xbf16, #tpu.memory_space<vmem>>, %arg5: memref<32x32xbf16, #tpu.memory_space<vmem>>, %arg6: memref<16x32xbf16, #tpu.memory_space<vmem>>, %arg7: memref<1x16xf32, #tpu.memory_space<vmem>>, %arg8: memref<2x1x128xf32, #tpu.memory_space<vmem>>, %arg9: memref<2x16x32xbf16, #tpu.memory_space<vmem>>) attributes {dimension_semantics = [#tpu.dimension_semantics<parallel>], iteration_bounds = array<i64: 2>, scalar_prefetch = 0 : i64, scratch_operands = 0 : i64, tpu.core_type = #tpu.core_type<tc>, window_params = [{transform_indices = @transform_0, window_bounds = array<i64: 2, 16, 32>}, {transform_indices = @transform_1, window_bounds = array<i64: 2, 16, 32>}, {pipeline_mode = #tpu.pipeline_mode<synchronous>, transform_indices = @transform_2, window_bounds = array<i64: 32, 16>}, {pipeline_mode = #tpu.pipeline_mode<synchronous>, transform_indices = @transform_3, window_bounds = array<i64: 2, 32, 32>}, {pipeline_mode = #tpu.pipeline_mode<synchronous>, transform_indices = @transform_4, window_bounds = array<i64: 32, 32>}, {pipeline_mode = #tpu.pipeline_mode<synchronous>, transform_indices = @transform_5, window_bounds = array<i64: 16, 32>}, {pipeline_mode = #tpu.pipeline_mode<synchronous>, transform_indices = @transform_6, window_bounds = array<i64: 1, 16>}, {transform_indices = @transform_7, window_bounds = array<i64: 2, 1, 128>}, {transform_indices = @transform_8, window_bounds = array<i64: 2, 16, 32>}]} {
    %c0 = arith.constant 0 : index
    %c0_0 = arith.constant 0 : index
    %c0_1 = arith.constant 0 : index
    %0 = vector.load %arg1[%c0, %c0_0, %c0_1] : memref<2x16x32xbf16, #tpu.memory_space<vmem>>, vector<2x16x32xbf16>
    %c0_2 = arith.constant 0 : index
    %c0_3 = arith.constant 0 : index
    %c0_4 = arith.constant 0 : index
    %1 = vector.load %arg2[%c0_2, %c0_3, %c0_4] : memref<2x16x32xbf16, #tpu.memory_space<vmem>>, vector<2x16x32xbf16>
    %2 = arith.addf %0, %1 : vector<2x16x32xbf16>
    %3 = vector.shape_cast %2 : vector<2x16x32xbf16> to vector<32x32xbf16>
    %4 = vector.shape_cast %0 : vector<2x16x32xbf16> to vector<32x32xbf16>
    %c0_5 = arith.constant 0 : index
    %c0_6 = arith.constant 0 : index
    %c0_7 = arith.constant 0 : index
    %5 = vector.load %arg4[%c0_5, %c0_6, %c0_7] : memref<2x32x32xbf16, #tpu.memory_space<vmem>>, vector<1x32x32xbf16>
    %6 = vector.shape_cast %5 : vector<1x32x32xbf16> to vector<32x32xbf16>
    %cst = arith.constant dense<0.000000e+00> : vector<32x32xf32>
    %7 = tpu.matmul %3, %6, %cst {dimension_numbers = #tpu.dot_dimension_numbers<[1], [0], [0], [1], [0, 0, 1, 1], [], []>} : vector<32x32xbf16>, vector<32x32xbf16>, vector<32x32xf32> -> vector<32x32xf32>
    %8 = arith.truncf %7 : vector<32x32xf32> to vector<32x32xbf16>
    %c1 = arith.constant 1 : index
    %c0_8 = arith.constant 0 : index
    %c0_9 = arith.constant 0 : index
    %9 = vector.load %arg4[%c1, %c0_8, %c0_9] : memref<2x32x32xbf16, #tpu.memory_space<vmem>>, vector<1x32x32xbf16>
    %10 = vector.shape_cast %9 : vector<1x32x32xbf16> to vector<32x32xbf16>
    %cst_10 = arith.constant dense<0.000000e+00> : vector<32x32xf32>
    %11 = tpu.matmul %4, %10, %cst_10 {dimension_numbers = #tpu.dot_dimension_numbers<[1], [0], [0], [1], [0, 0, 1, 1], [], []>} : vector<32x32xbf16>, vector<32x32xbf16>, vector<32x32xf32> -> vector<32x32xf32>
    %12 = arith.truncf %11 : vector<32x32xf32> to vector<32x32xbf16>
    %c0_11 = arith.constant 0 : index
    %c0_12 = arith.constant 0 : index
    %13 = vector.load %arg3[%c0_11, %c0_12] : memref<32x16xbf16, #tpu.memory_space<vmem>>, vector<32x16xbf16>
    %cst_13 = arith.constant dense<0.000000e+00> : vector<32x16xf32>
    %14 = tpu.matmul %8, %13, %cst_13 {dimension_numbers = #tpu.dot_dimension_numbers<[1], [0], [0], [1], [0, 0, 1, 1], [], []>} : vector<32x32xbf16>, vector<32x16xbf16>, vector<32x16xf32> -> vector<32x16xf32>
    %15 = vector.shape_cast %14 : vector<32x16xf32> to vector<2x16x16xf32>
    %16 = tpu.iota {dimensions = array<i32: 1>} : vector<1x16x1xi32>
    %c12_i32 = arith.constant 12 : i32
    %17 = vector.broadcast %c12_i32 : i32 to vector<1x16x1xi32>
    %18 = arith.cmpi slt, %16, %17 : vector<1x16x1xi32>
    %cst_14 = arith.constant -1.000000e+30 : f32
    %19 = vector.shape_cast %18 : vector<1x16x1xi1> to vector<1x16x1xi1>
    %20 = vector.broadcast %19 : vector<1x16x1xi1> to vector<2x16x16xi1>
    %21 = vector.broadcast %cst_14 : f32 to vector<2x16x16xf32>
    %22 = arith.select %20, %15, %21 : vector<2x16x16xi1>, vector<2x16x16xf32>
    %cst_15 = arith.constant dense<0xFF800000> : vector<2x16xf32>
    %23 = vector.multi_reduction <maximumf>, %22, %cst_15 [1] : vector<2x16x16xf32> to vector<2x16xf32>
    %24 = vector.shape_cast %23 : vector<2x16xf32> to vector<2x1x16xf32>
    %25 = vector.broadcast %24 : vector<2x1x16xf32> to vector<2x16x16xf32>
    %26 = arith.subf %22, %25 : vector<2x16x16xf32>
    %27 = math.exp %26 : vector<2x16x16xf32>
    %cst_16 = arith.constant dense<0.000000e+00> : vector<2x16xf32>
    %28 = vector.multi_reduction <add>, %27, %cst_16 [1] : vector<2x16x16xf32> to vector<2x16xf32>
    %29 = vector.shape_cast %28 : vector<2x16xf32> to vector<2x1x16xf32>
    %30 = tpu.reciprocal %29 {approx = true} : vector<2x1x16xf32> -> vector<2x1x16xf32>
    %31 = vector.broadcast %30 : vector<2x1x16xf32> to vector<2x16x16xf32>
    %32 = arith.mulf %27, %31 : vector<2x16x16xf32>
    %33 = tpu.transpose %32, [0, 2, 1] : vector<2x16x16xf32> -> vector<2x16x16xf32>
    %34 = arith.truncf %33 : vector<2x16x16xf32> to vector<2x16x16xbf16>
    %35 = vector.shape_cast %12 : vector<32x32xbf16> to vector<2x16x32xbf16>
    "tpu.trace_start"() <{level = 10 : i32, message = "bks,bsd->bkd"}> : () -> ()
    %cst_17 = arith.constant dense<0.000000e+00> : vector<2x16x32xf32>
    %36 = tpu.matmul %34, %35, %cst_17 {dimension_numbers = #tpu.dot_dimension_numbers<[2], [1], [1], [2], [0, 0, 0, 1, 1, 2], [0], [0]>} : vector<2x16x16xbf16>, vector<2x16x32xbf16>, vector<2x16x32xf32> -> vector<2x16x32xf32>
    "tpu.trace_stop"() : () -> ()
    %37 = vector.shape_cast %36 : vector<2x16x32xf32> to vector<32x32xf32>
    %38 = arith.truncf %37 : vector<32x32xf32> to vector<32x32xbf16>
    %c0_18 = arith.constant 0 : index
    %c0_19 = arith.constant 0 : index
    %39 = vector.load %arg5[%c0_18, %c0_19] : memref<32x32xbf16, #tpu.memory_space<vmem>>, vector<32x32xbf16>
    %cst_20 = arith.constant dense<0.000000e+00> : vector<32x32xf32>
    %40 = tpu.matmul %38, %39, %cst_20 {dimension_numbers = #tpu.dot_dimension_numbers<[1], [0], [0], [1], [0, 0, 1, 1], [], []>} : vector<32x32xbf16>, vector<32x32xbf16>, vector<32x32xf32> -> vector<32x32xf32>
    %41 = vector.shape_cast %40 : vector<32x32xf32> to vector<2x16x32xf32>
    %c0_21 = arith.constant 0 : index
    %c0_22 = arith.constant 0 : index
    %42 = vector.load %arg6[%c0_21, %c0_22] : memref<16x32xbf16, #tpu.memory_space<vmem>>, vector<16x32xbf16>
    %43 = arith.extf %42 : vector<16x32xbf16> to vector<16x32xf32>
    %44 = vector.shape_cast %43 : vector<16x32xf32> to vector<1x16x32xf32>
    %45 = vector.broadcast %44 : vector<1x16x32xf32> to vector<2x16x32xf32>
    %46 = arith.mulf %45, %41 : vector<2x16x32xf32>
    %cst_23 = arith.constant dense<0.000000e+00> : vector<2x16xf32>
    %47 = vector.multi_reduction <add>, %46, %cst_23 [2] : vector<2x16x32xf32> to vector<2x16xf32>
    %c0_24 = arith.constant 0 : index
    %c0_25 = arith.constant 0 : index
    %48 = vector.load %arg7[%c0_24, %c0_25] : memref<1x16xf32, #tpu.memory_space<vmem>>, vector<1x16xf32>
    %49 = vector.broadcast %48 : vector<1x16xf32> to vector<2x16xf32>
    %50 = arith.addf %47, %49 : vector<2x16xf32>
    %cst_26 = arith.constant 0.000000e+00 : f32
    %51 = vector.broadcast %cst_26 : f32 to vector<2x112xf32>
    %52 = tpu.concatenate %50, %51 in 1 : vector<2x16xf32>, vector<2x112xf32> -> vector<2x128xf32>
    %53 = vector.shape_cast %52 : vector<2x128xf32> to vector<2x1x128xf32>
    %c0_27 = arith.constant 0 : index
    %c0_28 = arith.constant 0 : index
    %c0_29 = arith.constant 0 : index
    %54 = vector.load %arg8[%c0_27, %c0_28, %c0_29] : memref<2x1x128xf32, #tpu.memory_space<vmem>>, vector<2x1x128xf32>
    tpu.vector_store %arg8[%c0_27, %c0_28, %c0_29], %53 {strides = array<i32>} : memref<2x1x128xf32, #tpu.memory_space<vmem>>, vector<2x1x128xf32>,
    %55 = arith.truncf %41 : vector<2x16x32xf32> to vector<2x16x32xbf16>
    %c0_30 = arith.constant 0 : index
    %c0_31 = arith.constant 0 : index
    %c0_32 = arith.constant 0 : index
    %56 = vector.load %arg9[%c0_30, %c0_31, %c0_32] : memref<2x16x32xbf16, #tpu.memory_space<vmem>>, vector<2x16x32xbf16>
    tpu.vector_store %arg9[%c0_30, %c0_31, %c0_32], %55 {strides = array<i32>} : memref<2x16x32xbf16, #tpu.memory_space<vmem>>, vector<2x16x32xbf16>,
    return
  }
  func.func @transform_0(%arg0: i32) -> (i32, i32, i32) {
    %c0_i32 = arith.constant 0 : i32
    %c0_i32_0 = arith.constant 0 : i32
    %c0_i32_1 = arith.constant 0 : i32
    return %arg0, %c0_i32, %c0_i32_0 : i32, i32, i32
  }
  func.func @transform_1(%arg0: i32) -> (i32, i32, i32) {
    %c0_i32 = arith.constant 0 : i32
    %c0_i32_0 = arith.constant 0 : i32
    %c0_i32_1 = arith.constant 0 : i32
    return %arg0, %c0_i32, %c0_i32_0 : i32, i32, i32
  }
  func.func @transform_2(%arg0: i32) -> (i32, i32) {
    %c0_i32 = arith.constant 0 : i32
    %c0_i32_0 = arith.constant 0 : i32
    %c0_i32_1 = arith.constant 0 : i32
    return %c0_i32, %c0_i32_0 : i32, i32
  }
  func.func @transform_3(%arg0: i32) -> (i32, i32, i32) {
    %c0_i32 = arith.constant 0 : i32
    %c0_i32_0 = arith.constant 0 : i32
    %c0_i32_1 = arith.constant 0 : i32
    %c0_i32_2 = arith.constant 0 : i32
    return %c0_i32, %c0_i32_0, %c0_i32_1 : i32, i32, i32
  }
  func.func @transform_4(%arg0: i32) -> (i32, i32) {
    %c0_i32 = arith.constant 0 : i32
    %c0_i32_0 = arith.constant 0 : i32
    %c0_i32_1 = arith.constant 0 : i32
    return %c0_i32, %c0_i32_0 : i32, i32
  }
  func.func @transform_5(%arg0: i32) -> (i32, i32) {
    %c0_i32 = arith.constant 0 : i32
    %c0_i32_0 = arith.constant 0 : i32
    %c0_i32_1 = arith.constant 0 : i32
    return %c0_i32, %c0_i32_0 : i32, i32
  }
  func.func @transform_6(%arg0: i32) -> (i32, i32) {
    %c0_i32 = arith.constant 0 : i32
    %c0_i32_0 = arith.constant 0 : i32
    %c0_i32_1 = arith.constant 0 : i32
    return %c0_i32, %c0_i32_0 : i32, i32
  }
  func.func @transform_7(%arg0: i32) -> (i32, i32, i32) {
    %c0_i32 = arith.constant 0 : i32
    %c0_i32_0 = arith.constant 0 : i32
    %c0_i32_1 = arith.constant 0 : i32
    return %arg0, %c0_i32, %c0_i32_0 : i32, i32, i32
  }
  func.func @transform_8(%arg0: i32) -> (i32, i32, i32) {
    %c0_i32 = arith.constant 0 : i32
    %c0_i32_0 = arith.constant 0 : i32
    %c0_i32_1 = arith.constant 0 : i32
    return %arg0, %c0_i32, %c0_i32_0 : i32, i32, i32
  }
}

</mosaic_0001>

<bundles_post_ra>
// kernel: q2l_forward.1
= control target key start
LH: loop header
LB: loop body
LE: loop exit
PB: predicated region body
PF: predicated region fallthrough
CT: control target
= control target key end

     0   :  { %s1357_s27 = smov 0   ;;  %s1458_s0 = inlined_call_operand.vmem [shape: bf16[4,16,32], index: 0, kind: input, shape index: {}]   ;;  %s1459_s1 = inlined_call_operand.vmem [shape: bf16[4,16,32], index: 1, kind: input, shape index: {}]   ;;  %s1460_s2 = inlined_call_operand.vmem [shape: bf16[32,16], index: 2, kind: input, shape index: {}]   ;;  %s1461_s3 = inlined_call_operand.vmem [shape: bf16[2,32,32], index: 3, kind: input, shape index: {}]   ;;  %s1462_s4 = inlined_call_operand.vmem [shape: bf16[32,32], index: 4, kind: input, shape index: {}]   ;;  %s1463_s5 = inlined_call_operand.vmem [shape: bf16[16,32], index: 5, kind: input, shape index: {}]   ;;  %s1464_s6 = inlined_call_operand.vmem [shape: f32[1,16], index: 6, kind: input, shape index: {}]   ;;  %s1465_s7 = inlined_call_operand.vmem [shape: f32[4,1,128], index: 7, kind: output, shape index: {0}]   ;;  %s1466_s8 = inlined_call_operand.vmem [shape: bf16[4,16,32], index: 8, kind: output, shape index: {1}]  }
   0x1 LB: > { %s1125_s28 = sadd.s32 4294967295, %s1306_s27   ;;  %p1129_p0 = scmp.ge.s32.totalorder %s1306_s27, 1  ;;  %s1306_s27 = sphi %s1357_s27, %s19_s27  }
   0x2   : > { %p279_p1 = scmp.lt.s32.totalorder %s1306_s27, 3 }
   0x4   : > { %p280_p2 = pnand %p1129_p0, %p279_p1 }
   0x5   : > { %v1278_v0 = vld [vmem:[%s1461_s3] sm:$0xff] (!%p280_p2)   ;;  %s1130_s9 = sshll.u32 (!%p280_p2), %s1125_s28, 1  ;;  %v1279_v1 = vld [vmem:[%s1461_s3 + $0x8] sm:$0xff] (!%p280_p2)   ;;  %vm390_vm0 = vcmask (!%p280_p2), 261120   ;;  %v1282_v18 = vld [vmem:[%s1461_s3 + $0x10] sm:$0xff] (!%p280_p2)   ;;  %v1308_v30 = vmov (!%p280_p2), 0.0   ;;  %v603_v35 = vlaneseq (!%p280_p2) }
   0x6   : > { %283 = sbr.rel (%p280_p2) target bundleno = 1387 (0x56b), region = 48  ;;  %p326_p3 = scmp.lt.s32.totalorder (!%p280_p2), %s1130_s9, 3  ;;  %1206 = vmatprep.subr.bf16.mxu0 (!%p280_p2), %v1278_v0  ;;  %v1280_v2 = vld [vmem:[%s1460_s2] sm:$0xff] (!%p280_p2)   ;;  %v1281_v17 = vld [vmem:[%s1460_s2 + $0x8] sm:$0xff] (!%p280_p2)   ;;  %v1283_v19 = vld [vmem:[%s1461_s3 + $0x18] sm:$0xff] (!%p280_p2)   ;;  %1214 = vmatprep.subr.bf16.mxu1 (!%p280_p2), %v1282_v18  ;;  %vm616_vm2 = vcmask (!%p280_p2), 130048  }
   0x7   : > { %1207 = vmatpush3.bf16.msra.mxu0 (!%p280_p2), %v1278_v0  ;;  %1215 = vmatpush3.bf16.msra.mxu1 (!%p280_p2), %v1282_v18  ;;  %v1405_v36 = vshrl.u32 (!%p280_p2), %v603_v35, 7  ;;  %vm1309_vm3 = vmmov (!%p280_p2), 0   ;;  %vm1022_vm4 = vcmask (!%p280_p2), 257024   ;;  %vm964_vm5 = vcmask (!%p280_p2), 130112  }
   0x8   : > { %1208 = vmatprep.subr.bf16.mxu0 (!%p280_p2), %v1279_v1  ;;  %1216 = vmatprep.subr.bf16.mxu1 (!%p280_p2), %v1283_v19  ;;  %vm975_vm6 = vcmask (!%p280_p2), 1041409  }
   0x9   : > { %v605_v37 = vadd.s32 (!%p280_p2), 8, %v1405_v36 }
   0xb   : > { %1209 = vmatpush3.bf16.msra.mxu0 (!%p280_p2), %v1279_v1  ;;  %1217 = vmatpush3.bf16.msra.mxu1 (!%p280_p2), %v1283_v19  ;;  %vm607_vm1 = vcmp.lt.s32.totalorder (!%p280_p2), %v605_v37, 12 }
   0xc   : > { %1222 = vmatprep.subr.bf16.mxu0 (!%p280_p2), %v1280_v2  ;;  %1230 = vmatprep.subr.bf16.mxu1 (!%p280_p2), %v1308_v30 }
   0xd   : > { %s1468_s9 = smov (!%p326_p3, %s1130_s9), 3 }
   0xe   : > { %s1377_s14 = sshll.u32 %s1468_s9, 3 }
   0xf   : > { %s330_s17 = scalar_lea.vmem %s1458_s0, %s1377_s14  ;;  %s337_s20 = scalar_lea.vmem %s1459_s1, %s1377_s14 }
  0x10   : > { %v352_v3 = vld [vmem:[%s330_s17] sm:$0xf]  ;;  %v353_v4 = vld [vmem:[%s330_s17 + $0x4] sm:$0xf]  ;;  %v354_v8 = vld [vmem:[%s330_s17 + $0x8] sm:$0xf]  ;;  %s349_s18 = scalar_lea.vmem %s1466_s8, %s1377_s14 }
  0x11   : > { %v356_v5 = vld [vmem:[%s337_s20] sm:$0xf]  ;;  %v357_v6 = vld [vmem:[%s337_s20 + $0x4] sm:$0xf]  ;;  %v355_v9 = vld [vmem:[%s330_s17 + $0xc] sm:$0xf]  ;;  %v1150_v20 = vcombine.low %v352_v3, %v353_v4 }
  0x12   : > { %v360_v7 = vadd.bf16 %v356_v5, %v352_v3  ;;  %v361_v10 = vadd.bf16 %v357_v6, %v353_v4  ;;  %v358_v11 = vld [vmem:[%s337_s20 + $0x8] sm:$0xf]  ;;  %v359_v12 = vld [vmem:[%s337_s20 + $0xc] sm:$0xf]  ;;  %v1151_v21 = vcombine.low %v354_v8, %v355_v9  ;;  %s342_s20 = scalar_lea.vmem %s1465_s7, %s1468_s9 }
  0x13   : > { %v362_v13 = vadd.bf16 %v358_v11, %v354_v8  ;;  %v363_v14 = vadd.bf16 %v359_v12, %v355_v9  ;;  %1218 = vmatprep.mubr.msk.bf16.mxu1 %vm390_vm0, %v1150_v20 }
  0x14   : > { %v1140_v15 = vcombine.low %v360_v7, %v361_v10  ;;  %1219 = vmatmul.mubr.msk.bf16.vlgmr.msra.gmra.mrb[0].mxu1 %vm390_vm0, %v1151_v21 }
  0x15   : > { %v1141_v16 = vcombine.low %v362_v13, %v363_v14  ;;  %1232 = vmatprep.mubr.msk.bf16.mxu1 %vm1309_vm3, %v1308_v30 }
  0x16   : > { %1210 = vmatprep.mubr.msk.bf16.mxu0 %vm390_vm0, %v1140_v15 }
  0x17   : > { %1211 = vmatmul.mubr.msk.bf16.vlgmr.msra.gmra.mrb[0].mxu0 %vm390_vm0, %v1141_v16 }
  0x18   : > { %1223 = vmatpush3.bf16.msra.mxu0 %v1280_v2 }
  0x19   : > { %1224 = vmatprep.subr.bf16.mxu0 %v1281_v17 }
  0x1c   : > { %1225 = vmatpush3.bf16.msra.mxu0 %v1281_v17 }
  0x1d   : > { %1236 = vmatprep.subr.bf16.mxu0 %v1308_v30 }
  0xe7   : > { %v1220_v28 = vpop.f32.mrb[0].mxu1 }
  0xe8   : > { %v515_v29 = vpop.f32.mrb[1].mxu1 }
  0xe9   : > { %v1221_v31 = vpop.f32.mrb[2].mxu1 }
  0xea   : > { %v1212_v22 = vpop.f32.mrb[0].mxu0  ;;  %v531_v32 = vpack.c.bf16 %v1221_v31, %v1220_v28  ;;  %v518_v33 = vpop.f32.mrb[3].mxu1 }
  0xeb   : > { %v431_v23 = vpop.f32.mrb[1].mxu0  ;;  %v530_v34 = vpack.c.bf16 %v518_v33, %v515_v29 }
  0xec   : > { %v1213_v24 = vpop.f32.mrb[2].mxu0 }
  0xed   : > { %v447_v25 = vpack.c.bf16 %v1213_v24, %v1212_v22  ;;  %v434_v26 = vpop.f32.mrb[3].mxu0  ;;  %1231 = vmatpush3.bf16.msra.mxu1 %v530_v34 }
  0xee   : > { %v446_v27 = vpack.c.bf16 %v434_v26, %v431_v23 }
  0xf0   : > { %1226 = vmatprep.mubr.msk.bf16.mxu0 %vm390_vm0, %v446_v27 }
  0xf1   : > { %1227 = vmatmul.mubr.msk.bf16.vlgmr.msra.gmra.mrb[4].mxu0 %vm390_vm0, %v447_v25 }
  0xf2   : > { %1237 = vmatpush3.bf16.msra.mxu0 %v531_v32  ;;  %1238 = vmatprep.mubr.msk.bf16.mxu0 %vm1309_vm3, %v1308_v30  ;;  %v1287_v30 = vld [vmem:[%s1462_s4 + $0x8] sm:$0xff]  }
 0x1c4   : > { %v1228_v38 = vpop.f32.mrb[4].mxu0 }
 0x1c5   : > { %v588_v39 = vpop.f32.mrb[5].mxu0  ;;  %v626_v43 = vsel %vm616_vm2, %v1228_v38, -inf }
 0x1c6   : > { %v1229_v40 = vpop.f32.mrb[6].mxu0  ;;  %v617_v46 = vsel %vm616_vm2, %v588_v39, -inf }
 0x1c7   : > { %v615_v41 = vsel %vm607_vm1, %v1229_v40, -1e+30  ;;  %v591_v42 = vpop.f32.mrb[7].mxu0 }
 0x1c8   : > { %v627_v44 = vsel %vm616_vm2, %v615_v41, -inf  ;;  %v613_v45 = vsel %vm607_vm1, %v591_v42, -1e+30 }
 0x1c9   : > { %v628_v47 = vmax.f32 %v626_v43, %v627_v44  ;;  %v618_v48 = vsel %vm616_vm2, %v613_v45, -inf }
 0x1ca   : > { %v619_v49 = vmax.f32 %v617_v46, %v618_v48  ;;  %v1166_v48 = vld [vmem:[%s1464_s6] ss:$0 sm:$0xff] }
 0x1cb   : > { %v629_v50 = vrot.slane %v628_v47, 4  ;;  %925 = vbcast.lane.b32.xlu1 %v1166_v48, 256 }
 0x1cc   : > { %v620_v51 = vrot.slane %v619_v49, 4 }
 0x1cd   : > { %v630_v52 = vmax.f32 %v628_v47, %v629_v50 }
 0x1ce   : > { %v621_v53 = vmax.f32 %v619_v49, %v620_v51 }
 0x1cf   : > { %v631_v54 = vrot.slane %v630_v52, 2 }
 0x1d0   : > { %v622_v55 = vrot.slane %v621_v53, 2 }
 0x1d1   : > { %v632_v56 = vmax.f32 %v630_v52, %v631_v54 }
 0x1d2   : > { %v623_v57 = vmax.f32 %v621_v53, %v622_v55 }
 0x1d3   : > { %v633_v58 = vrot.slane %v632_v56, 1 }
 0x1d4   : > { %v624_v59 = vrot.slane %v623_v57, 1 }
 0x1d5   : > { %v634_v60 = vmax.f32 %v632_v56, %v633_v58 }
 0x1d6   : > { %v625_v61 = vmax.f32 %v623_v57, %v624_v59  ;;  %v1183_v59 = vld [vmem:[%s1463_s5] sm:$0xff]  }
 0x1d7   : > { %v637_v62 = vsub.f32 %v1228_v38, %v634_v60  ;;  %v638_v63 = vsub.f32 %v615_v41, %v634_v60  ;;  %v1184_v60 = vunpack.c.l.bf16 %v1183_v59 }
 0x1d8   : > { %v635_v0 = vsub.f32 %v588_v39, %v625_v61  ;;  %v636_v1 = vsub.f32 %v613_v45, %v625_v61  ;;  %v1286_v39 = vld [vmem:[%s1462_s4] sm:$0xff]  }
 0x1d9   : > { %v643_v2 = vmul.f32 1.442695, %v637_v62  ;;  %v645_v3 = vmul.f32 1.442695, %v638_v63  ;;  %1242 = vmatprep.subr.bf16.mxu1 %v1286_v39  ;;  %v1185_v62 = vunpack.c.h.bf16 %v1183_v59 }
 0x1da   : > { %v639_v4 = vmul.f32 1.442695, %v635_v0  ;;  %v641_v5 = vmul.f32 1.442695, %v636_v1 }
 0x1db   : > { %1288 = vpow2.f32 %v643_v2 }
 0x1dc   : > { %1290 = vpow2.f32 %v645_v3 }
 0x1dd   : > { %1292 = vpow2.f32 %v639_v4 }
 0x1de   : > { %1294 = vpow2.f32 %v641_v5 }
 0x1e5   : > { %v1289_v6 = vpop.eup %1288 }
 0x1e6   : > { %v1291_v7 = vpop.eup %1290  ;;  %v656_v8 = vsel %vm616_vm2, %v1289_v6, 0.0 }
 0x1e7   : > { %v1293_v9 = vpop.eup %1292  ;;  %v657_v10 = vsel %vm616_vm2, %v1291_v7, 0.0 }
 0x1e8   : > { %v1295_v11 = vpop.eup %1294  ;;  %v658_v12 = vadd.f32 %v657_v10, %v656_v8  ;;  %v647_v13 = vsel %vm616_vm2, %v1293_v9, 0.0 }
 0x1e9   : > { %v648_v14 = vsel %vm616_vm2, %v1295_v11, 0.0 }
 0x1ea   : > { %v659_v15 = vrot.slane %v658_v12, 4  ;;  %v649_v16 = vadd.f32 %v648_v14, %v647_v13  ;;  %v1310_v14 = vmov 0  }
 0x1eb   : > { %1276 = vset.pattern.permute.xlu1 %v1310_v14 }
 0x1ec   : > { %v660_v17 = vadd.f32 %v659_v15, %v658_v12  ;;  %v650_v18 = vrot.slane %v649_v16, 4 }
 0x1ee   : > { %v651_v19 = vadd.f32 %v650_v18, %v649_v16  ;;  %v661_v20 = vrot.slane %v660_v17, 2 }
 0x1f0   : > { %v652_v21 = vrot.slane %v651_v19, 2  ;;  %v662_v22 = vadd.f32 %v661_v20, %v660_v17 }
 0x1f2   : > { %v653_v23 = vadd.f32 %v652_v21, %v651_v19  ;;  %v663_v24 = vrot.slane %v662_v22, 1 }
 0x1f4   : > { %v654_v25 = vrot.slane %v653_v23, 1  ;;  %v664_v26 = vadd.f32 %v663_v24, %v662_v22 }
 0x1f6   : > { %v655_v27 = vadd.f32 %v654_v25, %v653_v23  ;;  %1296 = vrcp.f32 %v664_v26  ;;  %v954_v26 = vand.u32 127, %v603_v35 }
 0x1f8   : > { %1298 = vrcp.f32 %v655_v27  ;;  %v959_v27 = vadd.s32 4294967288, %v954_v26 }
 0x200   : > { %v1297_v28 = vpop.eup %1296 }
 0x201   : > { %v669_v29 = vmul.f32 %v1297_v28, %v1289_v6  ;;  %v670_v31 = vmul.f32 %v1297_v28, %v1291_v7 }
 0x202   : > { %v1299_v32 = vpop.eup %1298 }
 0x203   : > { %v667_v33 = vmul.f32 %v1299_v32, %v1293_v9  ;;  %v668_v34 = vmul.f32 %v1299_v32, %v1295_v11  ;;  %v962_v32 = vsub.s32 %v959_v27, %v1405_v36 }
 0x205   : > { %v1262_v37 = vpack.i.bf16 %v669_v29, %v667_v33  ;;  %v1264_v38 = vpack.i.bf16 %v670_v31, %v668_v34  ;;  %v1311_v29 = vmov 1966171168   ;;  %v957_v34 = vsub.s32 %v954_v26, %v1405_v36 }
 0x206   : > { %v981_v31 = vunpack.c.l.s4 %v1311_v29 }
 0x207   : > { %1263 = vxpose.xlu0.b32.start [1/2] (short) (narrow) %v1262_v37, 16 }
 0x208   : > { %v982_v37 = vunpack.c.0.s8 %v981_v31 }
 0x20a   : > { %v985_v35 = vsub.s32 %v982_v37, %v1405_v36 }
 0x20b   : > { %1265 = vxpose.xlu0.b32.end [2/2] (short) (narrow) %v1264_v38, 16 }
 0x234   : > { %1277 = vset.pattern.permute.xlu0 %v1310_v14 }
 0x23d   : > { %v926_v15 = vpop.permute.xlu1 %925 }
 0x287   : > { %v1266_v40 = vpop.trf.xlu0 }
 0x288   : > { %v1270_v41 = vunpack.i.h.bf16 %v1266_v40  ;;  %v1267_v42 = vunpack.i.l.bf16 %v1266_v40 }
 0x28b   : > { %v1271_v43 = vpop.trf.xlu0 }
 0x28c   : > { %v1275_v44 = vunpack.i.h.bf16 %v1271_v43  ;;  %v1272_v45 = vunpack.i.l.bf16 %v1271_v43 }
 0x28e   : > { %v735_v46 = vpack.c.bf16 %v1272_v45, %v1267_v42  ;;  %v736_v47 = vpack.c.bf16 %v1275_v44, %v1270_v41 }
 0x290   : > { %1233 = vmatmul.mubr.msk.bf16.vlgmr.msra.gmra.mrb[4].mxu1 %vm616_vm2, %v735_v46  ;;  %1239 = vmatmul.mubr.msk.bf16.vlgmr.msra.gmra.mrb[8].mxu0 %vm616_vm2, %v736_v47 }
 0x291   : > { %1243 = vmatpush3.bf16.msra.mxu1 %v1286_v39 }
 0x292   : > { %1244 = vmatprep.subr.bf16.mxu1 %v1287_v30 }
 0x295   : > { %1245 = vmatpush3.bf16.msra.mxu1 %v1287_v30 }
 0x363   : > { %v774_v49 = vpop.f32.mrb[4].mxu1  ;;  %v818_v50 = vpop.f32.mrb[8].mxu0 }
 0x364   : > { %v1234_v51 = vpop.f32.mrb[5].mxu1  ;;  %v1240_v52 = vpop.f32.mrb[9].mxu0 }
 0x365   : > { %v777_v53 = vpop.f32.mrb[6].mxu1  ;;  %v821_v54 = vpop.f32.mrb[10].mxu0 }
 0x366   : > { %v825_v55 = vpack.c.bf16 %v777_v53, %v774_v49  ;;  %v826_v56 = vpack.c.bf16 %v821_v54, %v818_v50  ;;  %v1235_v57 = vpop.f32.mrb[7].mxu1  ;;  %v1241_v58 = vpop.f32.mrb[11].mxu0 }
 0x368   : > { %1246 = vmatprep.mubr.msk.bf16.mxu1 %vm390_vm0, %v825_v55 }
 0x369   : > { %1247 = vmatmul.mubr.msk.bf16.vlgmr.msra.gmra.mrb[8].mxu1 %vm390_vm0, %v826_v56 }
 0x43c   : > { %v1248_v61 = vpop.f32.mrb[8].mxu1 }
 0x43d   : > { %v904_v63 = vmul.f32 %v1248_v61, %v1184_v60  ;;  %v883_v0 = vpop.f32.mrb[9].mxu1  ;;  %v1180_v4 = vpack.c.bf16 %v1248_v61, %v1248_v61 }
 0x43e   : > { %v902_v1 = vmul.f32 %v1184_v60, %v883_v0  ;;  %v1178_v2 = vpack.c.bf16 %v883_v0, %v883_v0  ;;  %v1249_v3 = vpop.f32.mrb[10].mxu1 }
 0x43f   : > { %v886_v5 = vpop.f32.mrb[11].mxu1  ;;  %v912_v6 = vsel %vm390_vm0, %v904_v63, 0.0  ;;  %v905_v7 = vmul.f32 %v1249_v3, %v1185_v62  ;;  %1025 = vst.msk [vmem:[%s349_s18 + $0x8] sm:$0xf] %vm1022_vm4, %v1180_v4  ;;  %v1181_v10 = vpack.c.bf16 %v1249_v3, %v1249_v3 }
 0x440   : > { %1023 = vst.msk [vmem:[%s349_s18] sm:$0xf] %vm1022_vm4, %v1178_v2  ;;  %v1179_v8 = vpack.c.bf16 %v886_v5, %v886_v5  ;;  %913 = vadd.xlane.f32.xlu0 %v912_v6  ;;  %v906_v9 = vsel %vm390_vm0, %v902_v1, 0.0  ;;  %v903_v11 = vmul.f32 %v1185_v62, %v886_v5 }
 0x441   : > { %907 = vadd.xlane.f32.xlu1 %v906_v9  ;;  %1026 = vst.msk [vmem:[%s349_s18 + $0xc] sm:$0xf] %vm1022_vm4, %v1181_v10  ;;  %v915_v12 = vsel %vm390_vm0, %v905_v7, 0.0 }
 0x442   : > { %1024 = vst.msk [vmem:[%s349_s18 + $0x4] sm:$0xf] %vm1022_vm4, %v1179_v8  ;;  %v909_v13 = vsel %vm390_vm0, %v903_v11, 0.0 }
 0x445   : > { %916 = vadd.xlane.f32.xlu1 %v915_v12 }
 0x449   : > { %910 = vadd.xlane.f32.xlu1 %v909_v13 }
 0x45a   : > { %929 = vbcast.lane.b32.xlu1 %v1166_v48, 264 }
 0x4cd   : > { %v914_v16 = vpop.xlane.xlu0 %913 }
 0x4ce   : > { %v935_v17 = vadd.f32 %v926_v15, %v914_v16  ;;  %v908_v18 = vpop.xlane.xlu1 %907 }
 0x4cf   : > { %v933_v19 = vadd.f32 %v926_v15, %v908_v18 }
 0x4d0   : > { %948 = vperm.xlu1 %1276, %v935_v17  }
 0x4d2   : > { %v917_v20 = vpop.xlane.xlu1 %916 }
 0x4d4   : > { %942 = vperm.xlu1 %1276, %v933_v19  }
 0x4d6   : > { %v911_v21 = vpop.xlane.xlu1 %910 }
 0x4da   : > { %v930_v22 = vpop.permute.xlu1 %929 }
 0x4db   : > { %v934_v23 = vadd.f32 %v930_v22, %v911_v21  ;;  %v936_v24 = vadd.f32 %v930_v22, %v917_v20 }
 0x4dd   : > { %945 = vperm.xlu1 %1276, %v934_v23  }
 0x4e1   : > { %951 = vperm.xlu1 %1276, %v936_v24  }
 0x54f   : > { %v949_v25 = vpop.permute.xlu1 %948 }
 0x550   : > { %v969_v40 = vrot.slane %v949_v25, %v957_v34 }
 0x553   : > { %v943_v28 = vpop.permute.xlu1 %942 }
 0x554   : > { %v958_v41 = vrot.slane %v943_v28, %v957_v34 }
 0x55c   : > { %v946_v33 = vpop.permute.xlu1 %945 }
 0x55d   : > { %v963_v38 = vrot.slane %v946_v33, %v962_v32 }
 0x55f   : > { %v965_v43 = vsel %vm964_vm5, %v963_v38, %v958_v41 }
 0x560   : > { %v952_v39 = vpop.permute.xlu1 %951 }
 0x561   : > { %v973_v42 = vrot.slane %v952_v39, %v962_v32 }
 0x563   : > { %v974_v44 = vsel %vm964_vm5, %v973_v42, %v969_v40 }
 0x564   : > { %v976_v45 = vsel %vm975_vm6, %v974_v44, %v965_v43 }
 0x565   : > { %v978_v46 = vsel %vm616_vm2, %v976_v45, 0.0 }
 0x566   : > { %v986_v47 = vrot.slane %v978_v46, %v985_v35 }
 0x568   : > { %v987_v30 = vcombine.high %v986_v47, %v986_v47  ;;  %1167 = vst.sshfl [vmem:[%s342_s20] sm:$0x1 pattern:$0x73625140] %v986_v47 }
 0x56a   : > { %1168 = vst.sshfl [vmem:[%s342_s20 + $0x1] sm:$0x1 pattern:$0x73625140] %v987_v30 }
 0x56b PF: > { %s19_s27 = sadd.s32 1, %s1306_s27  }
 0x56c   : > { %p16_p4 = scmp.ge.s32.totalorder %s19_s27, 4  }
 0x56e   :  { %18 = sbr.rel (!%p16_p4) target bundleno = 1 (0x1), region = 94 }

</bundles_post_ra>
